<compile_context>
chip_gen: v6e
topology: v6e:2x2x1
jax: 0.10.0
libtpu: 0.0.40
codegen_flags: <defaults>
</compile_context>

<pallas_src>
import jax
import jax.numpy as jnp
from jax.experimental import pallas as pl
from jax.experimental.pallas import tpu as pltpu

_LANES = 128
_SUBLANES = 8
_NCORES = 2            # leading "parallel" grid axis -> 2 TensorCores on v7x, serial elsewhere
_MAX_TILE_ROWS = 4096  # 4096 x 128 x 4B = 2 MiB per input per pipeline buffer


def _round_up(x, m):
    return (x + m - 1) // m * m


def _vae_loss_kernel(pred_ref, tgt_ref, mu_ref, sigma_ref, part_ref):
    c = pl.program_id(0)   # per-core ("parallel") axis
    i = pl.program_id(1)   # tile reduction ("arbitrary") axis

    # Initialize this core's partial-sum vreg; fold the (tiny) KL term in exactly once,
    # on the first tile of core 0, at position (0, 0) of the accumulator vreg.
    @pl.when(i == 0)
    def _init():
        mu = mu_ref[...].astype(jnp.float32)
        sigma = sigma_ref[...].astype(jnp.float32)
        # KL( N(mu, sigma) || N(0, 1) ) = -log(sigma) + (sigma^2 + mu^2 - 1) / 2
        kl = -jnp.log(sigma) + 0.5 * (sigma * sigma + mu * mu - 1.0)
        kl_sum = jnp.where(c == 0, jnp.sum(kl), 0.0)
        row = jax.lax.broadcasted_iota(jnp.int32, (_SUBLANES, _LANES), 0)
        col = jax.lax.broadcasted_iota(jnp.int32, (_SUBLANES, _LANES), 1)
        part_ref[0] = jnp.where((row == 0) & (col == 0), kl_sum, 0.0)

    # BCELoss(reduction='sum') on this tile; PyTorch clamps log terms at -100.
    pred = pred_ref[...].astype(jnp.float32)
    tgt = tgt_ref[...].astype(jnp.float32)
    log_p = jnp.maximum(jnp.log(pred), -100.0)
    log_1mp = jnp.maximum(jnp.log(1.0 - pred), -100.0)
    bce = -(tgt * (log_p - log_1mp) + log_1mp)

    # Reduce the tile to one (8, 128) vreg with sublane-aligned VPU adds; the single
    # cross-lane reduction happens once, on the tiny (2, 8, 128) partials, in the wrapper.
    part_ref[0] += jnp.sum(bce.reshape(-1, _SUBLANES, _LANES), axis=0)


def vae_loss(output, target, mu, sigma):
    """output, target: [B, C, H, W] probabilities; mu, sigma: [B, Z] (sigma > 0). Returns scalar f32."""
    n = output.size
    rows = pl.cdiv(n, _LANES)
    tile_rows = min(_MAX_TILE_ROWS, _round_up(pl.cdiv(rows, _NCORES), _SUBLANES))
    steps = pl.cdiv(rows, _NCORES * tile_rows)
    padded_rows = _NCORES * tile_rows * steps

    flat_p = output.reshape(-1)
    flat_t = target.reshape(-1)
    pad = padded_rows * _LANES - n
    if pad:
        # (pred=1, tgt=1) contributes exactly 0 to the clamped BCE sum.
        flat_p = jnp.concatenate([flat_p, jnp.ones((pad,), flat_p.dtype)])
        flat_t = jnp.concatenate([flat_t, jnp.ones((pad,), flat_t.dtype)])
    p2d = flat_p.reshape(padded_rows, _LANES)
    t2d = flat_t.reshape(padded_rows, _LANES)

    tile_map = lambda c, i: (c * steps + i, 0)
    const_map = lambda c, i: (0, 0)

    partials = pl.pallas_call(
        _vae_loss_kernel,
        out_shape=jax.ShapeDtypeStruct((_NCORES, _SUBLANES, _LANES), jnp.float32),
        grid_spec=pltpu.PrefetchScalarGridSpec(
            num_scalar_prefetch=0,
            grid=(_NCORES, steps),
            in_specs=[
                pl.BlockSpec((tile_rows, _LANES), tile_map),
                pl.BlockSpec((tile_rows, _LANES), tile_map),
                pl.BlockSpec(mu.shape, const_map),      # resident: constant block index
                pl.BlockSpec(sigma.shape, const_map),   # resident: constant block index
            ],
            out_specs=pl.BlockSpec((1, _SUBLANES, _LANES), lambda c, i: (c, 0, 0)),
        ),
        compiler_params=pltpu.CompilerParams(
            dimension_semantics=("parallel", "arbitrary"),
            vmem_limit_bytes=32 * 1024 * 1024,
        ),
    )(p2d, t2d, mu, sigma)

    # Single cross-lane reduction over the per-core (8, 128) partials.
    return jnp.sum(partials)


if __name__ == "__main__":
    key = jax.random.PRNGKey(0)
    k1, k2, k3, k4 = jax.random.split(key, 4)

    B, C, H, W = 2, 4, 16, 16   # reconstruction shape (NCHW)
    Z = 32                      # latent dim

    # output in (0,1) as a VAE decoder with sigmoid head would produce
    output = jax.nn.sigmoid(jax.random.normal(k1, (B, C, H, W), dtype=jnp.float32))
    # target in [0,1]
    target = jax.random.uniform(k2, (B, C, H, W), dtype=jnp.float32)
    # encoding q = Normal(mu, sigma)
    mu = jax.random.normal(k3, (B, Z), dtype=jnp.float32)
    sigma = jax.nn.softplus(jax.random.normal(k4, (B, Z), dtype=jnp.float32)) + 1e-3

    loss = jax.block_until_ready(vae_loss(output, target, mu, sigma))

    # pure-JAX reference check
    log_o = jnp.maximum(jnp.log(output), -100.0)
    log_1mo = jnp.maximum(jnp.log(1.0 - output), -100.0)
    bce_ref = jnp.sum(-(target * log_o + (1.0 - target) * log_1mo))
    kl_ref = jnp.sum(-jnp.log(sigma) + 0.5 * (sigma ** 2 + mu ** 2 - 1.0))
    ref = bce_ref + kl_ref
    assert jnp.allclose(loss, ref, rtol=1e-5, atol=1e-3), (loss, ref)

    print("KERNEL_OK")
</pallas_src>

<mosaic_0001>
module attributes {stable_mosaic.version = 11 : i64} {
  func.func @_vae_loss_kernel(%arg0: i32, %arg1: i32, %arg2: memref<8x128xf32, #tpu.memory_space<vmem>>, %arg3: memref<8x128xf32, #tpu.memory_space<vmem>>, %arg4: memref<2x32xf32, #tpu.memory_space<vmem>>, %arg5: memref<2x32xf32, #tpu.memory_space<vmem>>, %arg6: memref<1x8x128xf32, #tpu.memory_space<vmem>>) attributes {dimension_semantics = [#tpu.dimension_semantics<parallel>, #tpu.dimension_semantics<arbitrary>], iteration_bounds = array<i64: 2, 1>, scalar_prefetch = 0 : i64, scratch_operands = 0 : i64, tpu.core_type = #tpu.core_type<tc>, window_params = [{transform_indices = @transform_0, window_bounds = array<i64: 8, 128>}, {transform_indices = @transform_1, window_bounds = array<i64: 8, 128>}, {pipeline_mode = #tpu.pipeline_mode<synchronous>, transform_indices = @transform_2, window_bounds = array<i64: 2, 32>}, {pipeline_mode = #tpu.pipeline_mode<synchronous>, transform_indices = @transform_3, window_bounds = array<i64: 2, 32>}, {transform_indices = @transform_4, window_bounds = array<i64: 1, 8, 128>}]} {
    %c0_i32 = arith.constant 0 : i32
    %0 = arith.cmpi eq, %arg1, %c0_i32 : i32
    %1 = arith.extui %0 : i1 to i32
    %c0_i32_0 = arith.constant 0 : i32
    %2 = arith.cmpi ne, %1, %c0_i32_0 : i32
    scf.if %2 {
      %c0_14 = arith.constant 0 : index
      %c0_15 = arith.constant 0 : index
      %26 = vector.load %arg4[%c0_14, %c0_15] : memref<2x32xf32, #tpu.memory_space<vmem>>, vector<2x32xf32>
      %c0_16 = arith.constant 0 : index
      %c0_17 = arith.constant 0 : index
      %27 = vector.load %arg5[%c0_16, %c0_17] : memref<2x32xf32, #tpu.memory_space<vmem>>, vector<2x32xf32>
      %28 = math.log %27 : vector<2x32xf32>
      %cst_18 = arith.constant 0.000000e+00 : f32
      %29 = vector.broadcast %cst_18 : f32 to vector<2x32xf32>
      %30 = arith.subf %29, %28 : vector<2x32xf32>
      %31 = arith.mulf %27, %27 : vector<2x32xf32>
      %32 = arith.mulf %26, %26 : vector<2x32xf32>
      %33 = arith.addf %31, %32 : vector<2x32xf32>
      %cst_19 = arith.constant 1.000000e+00 : f32
      %34 = vector.broadcast %cst_19 : f32 to vector<2x32xf32>
      %35 = arith.subf %33, %34 : vector<2x32xf32>
      %cst_20 = arith.constant 5.000000e-01 : f32
      %36 = vector.broadcast %cst_20 : f32 to vector<2x32xf32>
      %37 = arith.mulf %36, %35 : vector<2x32xf32>
      %38 = arith.addf %30, %37 : vector<2x32xf32>
      %c0_i32_21 = arith.constant 0 : i32
      %39 = arith.cmpi eq, %arg0, %c0_i32_21 : i32
      %40 = vector.shape_cast %38 : vector<2x32xf32> to vector<1x2x32xf32>
      %cst_22 = arith.constant dense<0.000000e+00> : vector<1xf32>
      %41 = vector.multi_reduction <add>, %40, %cst_22 [1, 2] : vector<1x2x32xf32> to vector<1xf32>
      %42 = vector.shape_cast %41 : vector<1xf32> to vector<1x1x1xf32>
      %43 = vector.extract %42[0, 0, 0] : f32 from vector<1x1x1xf32>
      %cst_23 = arith.constant 0.000000e+00 : f32
      %44 = arith.select %39, %43, %cst_23 : f32
      %45 = tpu.iota {dimensions = array<i32: 0>} : vector<8x128xi32>
      %46 = tpu.iota {dimensions = array<i32: 1>} : vector<8x128xi32>
      %c0_i32_24 = arith.constant 0 : i32
      %47 = vector.broadcast %c0_i32_24 : i32 to vector<8x128xi32>
      %48 = arith.cmpi eq, %45, %47 : vector<8x128xi32>
      %c0_i32_25 = arith.constant 0 : i32
      %49 = vector.broadcast %c0_i32_25 : i32 to vector<8x128xi32>
      %50 = arith.cmpi eq, %46, %49 : vector<8x128xi32>
      %51 = arith.andi %48, %50 : vector<8x128xi1>
      %cst_26 = arith.constant 0.000000e+00 : f32
      %52 = vector.broadcast %44 : f32 to vector<8x128xf32>
      %53 = vector.broadcast %cst_26 : f32 to vector<8x128xf32>
      %54 = arith.select %51, %52, %53 : vector<8x128xi1>, vector<8x128xf32>
      %c0_27 = arith.constant 0 : index
      %c0_28 = arith.constant 0 : index
      %c0_29 = arith.constant 0 : index
      %55 = vector.load %arg6[%c0_27, %c0_28, %c0_29] : memref<1x8x128xf32, #tpu.memory_space<vmem>>, vector<1x8x128xf32>
      %56 = vector.shape_cast %55 : vector<1x8x128xf32> to vector<8x128xf32>
      %57 = vector.shape_cast %54 : vector<8x128xf32> to vector<1x8x128xf32>
      tpu.vector_store %arg6[%c0_27, %c0_28, %c0_29], %57 {strides = array<i32>} : memref<1x8x128xf32, #tpu.memory_space<vmem>>, vector<1x8x128xf32>,
    } else {
    }
    %c0 = arith.constant 0 : index
    %c0_1 = arith.constant 0 : index
    %3 = vector.load %arg2[%c0, %c0_1] : memref<8x128xf32, #tpu.memory_space<vmem>>, vector<8x128xf32>
    %c0_2 = arith.constant 0 : index
    %c0_3 = arith.constant 0 : index
    %4 = vector.load %arg3[%c0_2, %c0_3] : memref<8x128xf32, #tpu.memory_space<vmem>>, vector<8x128xf32>
    %5 = math.log %3 : vector<8x128xf32>
    %cst = arith.constant -1.000000e+02 : f32
    %6 = vector.broadcast %cst : f32 to vector<8x128xf32>
    %7 = arith.maximumf %5, %6 : vector<8x128xf32>
    %cst_4 = arith.constant 1.000000e+00 : f32
    %8 = vector.broadcast %cst_4 : f32 to vector<8x128xf32>
    %9 = arith.subf %8, %3 : vector<8x128xf32>
    %10 = math.log %9 : vector<8x128xf32>
    %cst_5 = arith.constant -1.000000e+02 : f32
    %11 = vector.broadcast %cst_5 : f32 to vector<8x128xf32>
    %12 = arith.maximumf %10, %11 : vector<8x128xf32>
    %13 = arith.subf %7, %12 : vector<8x128xf32>
    %14 = arith.mulf %4, %13 : vector<8x128xf32>
    %15 = arith.addf %14, %12 : vector<8x128xf32>
    %cst_6 = arith.constant 0.000000e+00 : f32
    %16 = vector.broadcast %cst_6 : f32 to vector<8x128xf32>
    %17 = arith.subf %16, %15 : vector<8x128xf32>
    %c0_7 = arith.constant 0 : index
    %c0_8 = arith.constant 0 : index
    %c0_9 = arith.constant 0 : index
    %18 = vector.load %arg6[%c0_7, %c0_8, %c0_9] : memref<1x8x128xf32, #tpu.memory_space<vmem>>, vector<1x8x128xf32>
    %19 = vector.shape_cast %18 : vector<1x8x128xf32> to vector<8x128xf32>
    %20 = vector.shape_cast %17 : vector<8x128xf32> to vector<1x8x128xf32>
    %cst_10 = arith.constant dense<0.000000e+00> : vector<8x128xf32>
    %21 = vector.multi_reduction <add>, %20, %cst_10 [0] : vector<1x8x128xf32> to vector<8x128xf32>
    %22 = arith.addf %19, %21 : vector<8x128xf32>
    %c0_11 = arith.constant 0 : index
    %c0_12 = arith.constant 0 : index
    %c0_13 = arith.constant 0 : index
    %23 = vector.load %arg6[%c0_11, %c0_12, %c0_13] : memref<1x8x128xf32, #tpu.memory_space<vmem>>, vector<1x8x128xf32>
    %24 = vector.shape_cast %23 : vector<1x8x128xf32> to vector<8x128xf32>
    %25 = vector.shape_cast %22 : vector<8x128xf32> to vector<1x8x128xf32>
    tpu.vector_store %arg6[%c0_11, %c0_12, %c0_13], %25 {strides = array<i32>} : memref<1x8x128xf32, #tpu.memory_space<vmem>>, vector<1x8x128xf32>,
    return
  }
  func.func @transform_0(%arg0: i32, %arg1: i32) -> (i32, i32) {
    %c1_i32 = arith.constant 1 : i32
    %0 = arith.muli %arg0, %c1_i32 : i32
    %1 = arith.addi %0, %arg1 : i32
    %c0_i32 = arith.constant 0 : i32
    %c0_i32_0 = arith.constant 0 : i32
    return %1, %c0_i32 : i32, i32
  }
  func.func @transform_1(%arg0: i32, %arg1: i32) -> (i32, i32) {
    %c1_i32 = arith.constant 1 : i32
    %0 = arith.muli %arg0, %c1_i32 : i32
    %1 = arith.addi %0, %arg1 : i32
    %c0_i32 = arith.constant 0 : i32
    %c0_i32_0 = arith.constant 0 : i32
    return %1, %c0_i32 : i32, i32
  }
  func.func @transform_2(%arg0: i32, %arg1: i32) -> (i32, i32) {
    %c0_i32 = arith.constant 0 : i32
    %c0_i32_0 = arith.constant 0 : i32
    %c0_i32_1 = arith.constant 0 : i32
    return %c0_i32, %c0_i32_0 : i32, i32
  }
  func.func @transform_3(%arg0: i32, %arg1: i32) -> (i32, i32) {
    %c0_i32 = arith.constant 0 : i32
    %c0_i32_0 = arith.constant 0 : i32
    %c0_i32_1 = arith.constant 0 : i32
    return %c0_i32, %c0_i32_0 : i32, i32
  }
  func.func @transform_4(%arg0: i32, %arg1: i32) -> (i32, i32, i32) {
    %c0_i32 = arith.constant 0 : i32
    %c0_i32_0 = arith.constant 0 : i32
    %c0_i32_1 = arith.constant 0 : i32
    return %arg0, %c0_i32, %c0_i32_0 : i32, i32, i32
  }
}

</mosaic_0001>

<bundles_post_ra>
// kernel: tpu_custom_call.1
= control target key start
LH: loop header
LB: loop body
LE: loop exit
PB: predicated region body
PF: predicated region fallthrough
CT: control target
= control target key end

     0   :  { %9 = vsyncpa [#allocation3], 0  ;;  %s879_s0 = inlined_call_operand.hbm [shape: f32[16,128], index: 0, kind: input, shape index: {}]   ;;  %s880_s1 = inlined_call_operand.hbm [shape: f32[16,128], index: 1, kind: input, shape index: {}]   ;;  %s881_s2 = inlined_call_operand.vmem [shape: f32[2,32], index: 2, kind: input, shape index: {}]   ;;  %s882_s3 = inlined_call_operand.vmem [shape: f32[2,32], index: 3, kind: input, shape index: {}]   ;;  %s883_s4 = inlined_call_operand.hbm [shape: f32[2,8,128], index: 4, kind: output, shape index: {}]  }
   0x1   :  { %11 = vsyncpa [#allocation3 + $0x1], 0 }
   0x2   :  { %12 = vsyncpa [#allocation6], 0 }
   0x3   :  { %14 = vsyncpa [#allocation6 + $0x1], 0 }
   0x4   :  { %15 = vsyncpa [#allocation4], 0 }
   0x5   :  { %17 = vsyncpa [#allocation4 + $0x1], 0  ;;  %s704_s15 = smov 0   ;;  %s706_s16 = smov 0  }
   0x6   :  { %s708_s17 = smov 0   ;;  %s710_s18 = smov 0  }
   0x7   :  { %s712_s19 = smov 0   ;;  %s714_s20 = smov 0  }
   0x8 LB: > { %s442_s21 = sadd.s32 4294967295, %s674_s20   ;;  %s443_s22 = sadd.s32 4294967294, %s674_s20   ;;  %s674_s20 = sphi %s714_s20, %s23_s20   ;;  %s670_s19 = sphi %s712_s19, %s895_s19   ;;  %s666_s18 = sphi %s710_s18, %s894_s18   ;;  %s662_s17 = sphi %s708_s17, %s893_s17   ;;  %s658_s16 = sphi %s706_s16, %s892_s16   ;;  %s654_s15 = sphi %s704_s15, %s891_s15  }
   0x9   : > { %s35_s23 = sadd.s32 1, %s670_s19  ;;  %s44_s24 = sadd.s32 1, %s662_s17 }
   0xa   : > { %p37_p0 = scmp.ge.s32.totalorder %s35_s23, 2  ;;  %p51_p1 = scmp.ne.s32.totalorder %s662_s17, %s658_s16 }
   0xb   : > { %p52_p2 = scmp.eq.s32.totalorder %s674_s20, 0  ;;  %p57_p3 = scmp.ne.s32.totalorder %s658_s16, %s654_s15 }
   0xc   : > { %s897_s23 = smov (%p37_p0, %s35_s23), 0  ;;  %p58_p5 = scmp.eq.s32.totalorder %s442_s21, 0 }
   0xd   : > { %p745_p4 = por %p52_p2, %p51_p1  ;;  %s41_s26 = ssub.s32 %s670_s19, %s897_s23 }
   0xe   : > { %p151_p6 = scmp.eq.s32.totalorder %s442_s21, 1  ;;  %p42_p7 = scmp.eq.s32.totalorder %s41_s26, 0 }
   0xf   : > { %p751_p8 = por %p58_p5, %p57_p3  ;;  %p157_p10 = scmp.eq.s32.totalorder %s443_s22, 1 }
  0x10   : > { %p755_p9 = por %p151_p6, %p51_p1  ;;  %p478_p13 = scmp.lt.s32.totalorder %s674_s20, 2 }
  0x11   : > { %s760_s29 = scalar_select %p42_p7, %s662_s17, %s44_s24  }
  0x12   : > { %p762_p11 = por %p157_p10, %p57_p3  ;;  %s769_s5 = sand.u32 1, %s662_s17  }
  0x13   : > { %s446_s6 = sshll.u32 %s769_s5, 3  ;;  %s447_s7 = sshll.u32 %s670_s19, 7 }
  0x14   : > { %s193_s10 = scalar_lea.hbm %s879_s0, %s447_s7  ;;  %s187_s11 = scalar_lea.vmem [#allocation2], %s446_s6 }
  0x15   : > { %s195_s12 = sshll.u32 %s187_s11, 4  ;;  %p778_p0 = pnand %p478_p13, %p745_p4  ;;  %s196_s12 = int_to_ptr.vmem [resolvable:$true] %s195_s12 }
  0x16   : > { %p450_p1 = scmp.ge.s32.totalorder %s674_s20, 1  ;;  %p219_p2 = scmp.lt.s32.totalorder %s674_s20, 3 }
  0x17   : > { %s184_s14 = scalar_lea.sflag [#allocation3], %s769_s5  ;;  %p536_p3 = pneg %p778_p0 }
  0x18   : > { %s547_s21 = scalar_lea.vmem %s196_s12, 128  ;;  %s676_s22 = smov [#allocation2]  }
  0x19   : > { %p548_p5 = scmp.ne.s32.totalorder %s196_s12, %s547_s21  ;;  %s552_s24 = sshll.u32 %s676_s22, 4  ;;  %s553_s24 = int_to_ptr.vmem [resolvable:$false] %s552_s24 }
  0x1a   : > { %s554_s25 = scalar_lea.vmem %s553_s24, 256  ;;  %p555_p4 = scmp.lt.s32.totalorder %s196_s12, %s553_s24 }
  0x1b   : > { %p550_p6 = pnand %p548_p5, %p536_p3  ;;  %p556_p10 = scmp.lt.s32.totalorder %s554_s25, %s547_s21 }
  0x1d   : > { %p551_p7 = pneg %p550_p6  ;;  %p557_p13 = por %p556_p10, %p555_p4 }
  0x1f   : > { %p558_p12 = pnand %p557_p13, %p551_p7 }
  0x21   : > { %561 = shalt.err (!%p558_p12)
}
  0x22   : > { %470 = dma.hbm_to_vmem [thread:$0]  (!%p778_p0), %s193_s10, 128, %s196_s12, %s184_s14  }
  0x23   : > { %p796_p5 = pnand %p450_p1, %p219_p2  ;;  %s212_s11 = scalar_lea.hbm %s880_s1, %s447_s7 }
  0x24   : > { %s206_s21 = scalar_lea.vmem [#allocation5], %s446_s6  ;;  %s203_s24 = scalar_lea.sflag [#allocation6], %s769_s5 }
  0x25   : > { %s214_s22 = sshll.u32 %s206_s21, 4  ;;  %s677_s10 = smov [#allocation5]   ;;  %s215_s22 = int_to_ptr.vmem [resolvable:$true] %s214_s22 }
  0x26   : > { %s575_s25 = scalar_lea.vmem %s215_s22, 128  ;;  %s580_s12 = sshll.u32 %s677_s10, 4  ;;  %s581_s12 = int_to_ptr.vmem [resolvable:$false] %s580_s12 }
  0x27   : > { %p576_p12 = scmp.ne.s32.totalorder %s215_s22, %s575_s25  ;;  %s582_s14 = scalar_lea.vmem %s581_s12, 256 }
  0x28   : > { %p583_p1 = scmp.lt.s32.totalorder %s215_s22, %s581_s12  ;;  %p584_p2 = scmp.lt.s32.totalorder %s582_s14, %s575_s25 }
  0x29   : > { %p578_p6 = pnand %p576_p12, %p536_p3 }
  0x2a   : > { %p585_p4 = por %p584_p2, %p583_p1 }
  0x2b   : > { %p579_p7 = pneg %p578_p6 }
  0x2d   : > { %p586_p10 = pnand %p585_p4, %p579_p7 }
  0x2f   : > { %589 = shalt.err (!%p586_p10)
}
  0x30   : > { %473 = dma.hbm_to_vmem [thread:$0]  (!%p778_p0), %s212_s11, 128, %s215_s22, %s203_s24  }
  0x31   : > { %223 = sbr.rel (%p796_p5) target bundleno = 298 (0x12a), region = 36  ;;  %s812_s5 = sand.u32 (!%p796_p5), 1, %s658_s16  }
  0x32   : > { %s815_s6 = sshll.u32 (!%p796_p5), %s812_s5, 3  ;;  %s226_s7 = scalar_lea.sflag (!%p796_p5), [#allocation3], %s812_s5 }
  0x33   : > { %s229_s8 = scalar_lea.vmem (!%p796_p5), [#allocation2], %s815_s6 }
  0x36   : > { %641 = dma.done.wait (%p751_p8), %s226_s7, 128  }
  0x37   : > { %643 = vsyncadd (%p751_p8), %s226_s7, 4294967168  ;;  %s235_s13 = scalar_lea.sflag [#allocation6], %s812_s5  ;;  %s238_s26 = scalar_lea.vmem [#allocation5], %s815_s6 }
  0x38   : > { %645 = dma.done.wait (%p751_p8), %s235_s13, 128  }
  0x39   : > { %647 = vsyncadd (%p751_p8), %s235_s13, 4294967168  ;;  %v274_v0 = vld [vmem:[%s881_s2] sm:$0x3]  ;;  %vm286_vm0 = vcmask 254976   ;;  %v298_v28 = vlaneseq  ;;  %v309_v29 = vld [vmem:[%s238_s26] sm:$0xff]  ;;  %p285_p8 = scmp.eq.s32.totalorder %s666_s18, 0 }
  0x3a   : > { %v275_v1 = vld [vmem:[%s882_s3] sm:$0x3]  ;;  %v280_v3 = vmul.f32 %v274_v0, %v274_v0  ;;  %s456_s24 = sshll.u32 %s666_s18, 7  ;;  %s267_s25 = scalar_lea.vmem [#allocation7], %s815_s6 }
  0x3b   : > { %528 = vlog2.f32 %v275_v1  ;;  %v279_v2 = vmul.f32 %v275_v1, %v275_v1  ;;  %v308_v19 = vld [vmem:[%s229_s8] sm:$0xff]  ;;  %v299_v31 = vshrl.u32 %v298_v28, 7  ;;  %v301_v32 = vand.u32 127, %v298_v28  ;;  %s339_s10 = sshll.u32 %s267_s25, 4  ;;  %s337_s7 = scalar_lea.hbm %s883_s4, %s456_s24  ;;  %s340_s10 = int_to_ptr.vmem [resolvable:$true] %s339_s10 }
  0x3c   : > { %v313_v20 = vsub.f32 1.0, %v308_v19  ;;  %530 = vlog2.f32 %v308_v19  ;;  %s326_s8 = scalar_lea.sflag [#allocation4], %s812_s5  ;;  %s590_s13 = scalar_lea.vmem %s340_s10, 128 }
  0x3d   : > { %v281_v4 = vadd.f32 %v280_v3, %v279_v2  ;;  %vm302_vm1 = vcmp.eq.s32.totalorder %v299_v31, 0  ;;  %vm303_vm2 = vcmp.eq.s32.totalorder %v301_v32, 0  ;;  %p591_p0 = scmp.ne.s32.totalorder %s340_s10, %s590_s13  ;;  %s678_s26 = smov [#allocation7]  }
  0x3e   : > { %532 = vlog2.f32 %v313_v20  ;;  %vm304_vm3 = vmand %vm302_vm1, %vm303_vm2  ;;  %s594_s9 = sshll.u32 %s678_s26, 4  ;;  %s595_s9 = int_to_ptr.vmem [resolvable:$false] %s594_s9 }
  0x3f   : > { %v454_v5 = vadd.f32 -1.0, %v281_v4  ;;  %p592_p3 = pnand %p591_p0, %p755_p9  ;;  %s596_s18 = scalar_lea.vmem %s595_s9, 256 }
  0x40   : > { %p597_p5 = scmp.lt.s32.totalorder %s340_s10, %s595_s9  ;;  %p598_p12 = scmp.lt.s32.totalorder %s596_s18, %s590_s13 }
  0x41   : > { %v283_v8 = vmul.f32 0.5, %v454_v5  ;;  %p593_p13 = pneg %p592_p3 }
  0x42   : > { %p599_p6 = por %p598_p12, %p597_p5 }
  0x44   : > { %p600_p7 = pnand %p599_p6, %p593_p13 }
  0x48   : > { %v529_v6 = vpop.eup %528 }
  0x49   : > { %v277_v7 = vmul.f32 0.6931472, %v529_v6  ;;  %v531_v21 = vpop.eup %530 }
  0x4a   : > { %v311_v23 = vmul.f32 0.6931472, %v531_v21 }
  0x4b   : > { %v278_v9 = vsub.f32 0.0, %v277_v7  ;;  %v533_v22 = vpop.eup %532 }
  0x4c   : > { %v315_v24 = vmul.f32 0.6931472, %v533_v22  ;;  %v312_v25 = vmax.f32 %v311_v23, -100.0 }
  0x4d   : > { %v284_v10 = vadd.f32 %v283_v8, %v278_v9 }
  0x4e   : > { %v316_v26 = vmax.f32 %v315_v24, -100.0 }
  0x4f   : > { %v287_v11 = vsel %vm286_vm0, %v284_v10, 0.0 }
  0x50   : > { %288 = vadd.xlane.f32.xlu0 %v287_v11  ;;  %v317_v27 = vsub.f32 %v312_v25, %v316_v26 }
  0x52   : > { %v318_v30 = vmul.f32 %v317_v27, %v309_v29 }
  0x54   : > { %v319_v33 = vadd.f32 %v318_v30, %v316_v26 }
  0x56   : > { %v320_v34 = vsub.f32 0.0, %v319_v33 }
  0xd9   : > { %v289_v12 = vpop.xlane.xlu0 %288 }
  0xda   : > { %v290_v13 = vrot.slane %v289_v12, 4 }
  0xdc   : > { %v291_v14 = vadd.f32 %v290_v13, %v289_v12 }
  0xde   : > { %v292_v15 = vrot.slane %v291_v14, 2 }
  0xe0   : > { %v293_v16 = vadd.f32 %v292_v15, %v291_v14 }
  0xe2   : > { %v294_v17 = vrot.slane %v293_v16, 1 }
  0xe4   : > { %v295_v18 = vadd.f32 %v294_v17, %v293_v16 }
  0xe6   : > { %459 = vpush %v295_v18 }
 0x117   : > { %s460_s27 = spop %459 }
 0x118   : > { %s899_s27 = smov (!%p285_p8, %s460_s27), 0.0 }
 0x119   : > { %v305_v35 = vstv %s899_s27 }
 0x11a   : > { %v306_v36 = vsel %vm304_vm3, %v305_v35, 0.0 }
 0x11b   : > { %v323_v37 = vadd.f32 %v320_v34, %v306_v36 }
 0x11d   : > { %324 = vst [vmem:[%s267_s25] sm:$0xff] %v323_v37 }
 0x11e   : > { %603 = shalt.err (!%p600_p7)
}
 0x11f   : > { %s604_s6 = scalar_lea.hbm %s337_s7, 128  ;;  %s608_s21 = scalar_lea.hbm %s883_s4, 256 }
 0x120   : > { %p605_p1 = scmp.ne.s32.totalorder %s337_s7, %s604_s6  ;;  %p609_p10 = scmp.lt.s32.totalorder %s337_s7, %s883_s4 }
 0x121   : > { %p610_p8 = scmp.lt.s32.totalorder %s608_s21, %s604_s6 }
 0x122   : > { %p606_p2 = pnand %p605_p1, %p755_p9 }
 0x123   : > { %p611_p0 = por %p610_p8, %p609_p10 }
 0x124   : > { %p607_p4 = pneg %p606_p2 }
 0x126   : > { %p612_p3 = pnand %p611_p0, %p607_p4 }
 0x128   : > { %615 = shalt.err (!%p612_p3)
}
 0x129   : > { %465 = dma.vmem_to_hbm [thread:$0]  (%p755_p9), %s340_s10, 128, %s337_s7, %s326_s8  }
 0x12a PF: > { %s351_s24 = sand.u32 1, %s654_s15   ;;  %p890_p13 = scmp.ge.s32.totalorder %s674_s20, 2 }
 0x12b   : > { %s352_s25 = scalar_lea.sflag [#allocation4], %s351_s24 }
 0x12c   : > { %p475_p5 = pnand %p890_p13, %p762_p11 }
 0x12e   : > { %p476_p12 = pneg %p475_p5 }
 0x130   : > { %649 = dma.done.wait (%p476_p12), %s352_s25, 128  }
 0x131   : > { %651 = vsyncadd (%p476_p12), %s352_s25, 4294967168  ;;  %s23_s20 = sadd.s32 1, %s674_s20   ;;  %s891_s15 = smov %s658_s16 }
 0x132   : > { %p20_p6 = scmp.ge.s32.totalorder %s23_s20, 4   ;;  %s892_s16 = smov %s662_s17 }
 0x133   : > { %s893_s17 = smov %s760_s29  ;;  %s894_s18 = smov %s670_s19 }
 0x134   : > { %s895_s19 = smov %s897_s23  ;;  %22 = sbr.rel (!%p20_p6) target bundleno = 8 (0x8), region = 98 }
 0x139   :  { %357 = vsyncpa [#allocation3], 1 }
 0x13a   :  { %359 = vsyncpa [#allocation3 + $0x1], 1 }
 0x13b   :  { %360 = vsyncpa [#allocation6], 1 }
 0x13c   :  { %362 = vsyncpa [#allocation6 + $0x1], 1 }
 0x13d   :  { %363 = vsyncpa [#allocation4], 1 }
 0x13e   :  { %365 = vsyncpa [#allocation4 + $0x1], 1 }

</bundles_post_ra>
